<compile_context>
chip_gen: v7x
topology: tpu7x:2x2x1
jax: 0.10.0
libtpu: 0.0.40
codegen_flags: <defaults>
</compile_context>

<pallas_src>
import jax
import jax.numpy as jnp
from jax.experimental import pallas as pl
from jax.experimental.pallas import tpu as pltpu


H1, H2, HEAD = 400, 100, 4          # logical VAE widths (match the PyTorch module)
H1P, H2P = 512, 128                 # lane-padded widths (multiples of 128)


def vae_kernel(x_ref, w1_ref, b1_ref, w2_ref, b2_ref, w3_ref, b3_ref, eps_ref,
               z_ref, kl_ref):
    """One batch tile: fc(relu, relu, linear) -> reparameterize -> KL partial sum."""
    cdt = w1_ref.dtype                       # matmul operand dtype (bf16); f32 accumulate

    x = x_ref[...].astype(cdt)

    # fc layer 1: D -> 512 (padded 400), ReLU.  Bias add / ReLU in f32.
    h1 = jnp.dot(x, w1_ref[...], preferred_element_type=jnp.float32) + b1_ref[...]
    h1 = jnp.maximum(h1, 0.0)

    # fc layer 2: 512 -> 128 (padded 100), ReLU.
    h2 = jnp.dot(h1.astype(cdt), w2_ref[...],
                 preferred_element_type=jnp.float32) + b2_ref[...]
    h2 = jnp.maximum(h2, 0.0)

    # fused head: 128 -> 4 (mu | logvar) in one MXU pass; static lane slices.
    out = jnp.dot(h2.astype(cdt), w3_ref[...],
                  preferred_element_type=jnp.float32) + b3_ref[...]
    mu = out[:, 0:2]
    logvar = out[:, 2:4]

    # reparameterization: z = mu + exp(logvar / 2) * eps
    sigma = jnp.exp(logvar * 0.5)
    z_ref[...] = mu + sigma * eps_ref[...]

    # KL partial sum for this tile; exp(logvar) == sigma * sigma (reuse EUP result).
    kl_ref[0, 0] = -0.5 * jnp.sum(1.0 + logvar - mu * mu - sigma * sigma)


def pad_and_cast_params(params, matmul_dtype=jnp.bfloat16):
    """Zero-pad hidden dims to lane-native widths and pre-cast matmul weights once.

    Padding is exact: padded weight rows/cols and bias entries are zero, and
    ReLU(0) = 0 keeps the padded channels inert through the whole network.
    Biases stay f32 (they are added after the f32 MXU accumulation).
    """
    w1, b1, w2, b2, w3, b3 = params
    d = w1.shape[0]
    w1p = jnp.zeros((d, H1P), jnp.float32).at[:, :H1].set(w1)
    b1p = jnp.zeros((1, H1P), jnp.float32).at[:, :H1].set(b1)
    w2p = jnp.zeros((H1P, H2P), jnp.float32).at[:H1, :H2].set(w2)
    b2p = jnp.zeros((1, H2P), jnp.float32).at[:, :H2].set(b2)
    w3p = jnp.zeros((H2P, HEAD), jnp.float32).at[:H2, :].set(w3)
    return (w1p.astype(matmul_dtype), b1p,
            w2p.astype(matmul_dtype), b2p,
            w3p.astype(matmul_dtype), b3)


def vae_forward(x, padded_params, eps, *, tb=None):
    """Full VAE forward; batch-gridded, weights VMEM-resident, KL partials in SMEM."""
    w1, b1, w2, b2, w3, b3 = padded_params
    B, D = x.shape

    # Batch tile: keep per-step VMEM bounded (v7x has 64 MiB physical) while
    # amortizing per-grid-step overhead.  Fall back to a single tile if B
    # is not evenly divisible (zero-row padding would perturb the KL mean).
    if tb is None:
        tb = 256 if (B >= 256 and B % 256 == 0) else B
    if B % tb != 0:
        tb = B
    nt = B // tb

    const = lambda i: (0, 0)        # weights / biases: resident across the grid
    tile = lambda i: (i, 0)         # x / eps / z / kl: one block per batch tile

    z, kl_parts = pl.pallas_call(
        vae_kernel,
        out_shape=(
            jax.ShapeDtypeStruct((B, 2), jnp.float32),
            jax.ShapeDtypeStruct((nt, 1), jnp.float32),
        ),
        grid_spec=pltpu.PrefetchScalarGridSpec(
            num_scalar_prefetch=0,
            grid=(nt,),
            in_specs=[
                pl.BlockSpec((tb, D), tile),        # x
                pl.BlockSpec(w1.shape, const),      # W1  [D, 512]   (bf16)
                pl.BlockSpec(b1.shape, const),      # b1  [1, 512]   (f32)
                pl.BlockSpec(w2.shape, const),      # W2  [512, 128] (bf16)
                pl.BlockSpec(b2.shape, const),      # b2  [1, 128]   (f32)
                pl.BlockSpec(w3.shape, const),      # W3  [128, 4]   (bf16)
                pl.BlockSpec(b3.shape, const),      # b3  [1, 4]     (f32)
                pl.BlockSpec((tb, 2), tile),        # eps
            ],
            out_specs=(
                pl.BlockSpec((tb, 2), tile),        # z
                # scalar KL partial per tile -> SMEM (avoids lane-sparse vst.msk)
                pl.BlockSpec((1, 1), tile, memory_space=pltpu.MemorySpace.SMEM),
            ),
        ),
        compiler_params=pltpu.CompilerParams(
            dimension_semantics=("parallel",),      # batch tiles shard across v7x's 2 TCs
        ),
    )(x, w1, b1, w2, b2, w3, b3, eps)

    kl = jnp.sum(kl_parts) / B      # finish the batch mean outside the kernel
    return z, kl


def init_params(key, input_dim):
    """Deterministic init mimicking nn.Linear's U(-1/sqrt(fan_in), 1/sqrt(fan_in))."""
    dims = [input_dim, H1, H2, HEAD]
    params = []
    for i in range(3):
        key, kw, kb = jax.random.split(key, 3)
        fan_in, fan_out = dims[i], dims[i + 1]
        bound = fan_in ** -0.5
        w = jax.random.uniform(kw, (fan_in, fan_out), jnp.float32, -bound, bound)
        b = jax.random.uniform(kb, (1, fan_out), jnp.float32, -bound, bound)
        params.extend([w, b])
    return tuple(params)


def vae_reference(x, params, eps, matmul_dtype=jnp.bfloat16):
    """Pure-JAX reference (unpadded weights, same bf16-operand / f32-accum matmuls)."""
    w1, b1, w2, b2, w3, b3 = params

    def mm(a, w):
        return jnp.dot(a.astype(matmul_dtype), w.astype(matmul_dtype),
                       preferred_element_type=jnp.float32)

    h1 = jnp.maximum(mm(x, w1) + b1, 0.0)
    h2 = jnp.maximum(mm(h1, w2) + b2, 0.0)
    out = mm(h2, w3) + b3
    mu, logvar = out[:, :2], out[:, 2:]
    sigma = jnp.exp(logvar / 2.0)
    z = mu + sigma * eps
    kl = jnp.mean(-0.5 * jnp.sum(1.0 + logvar - mu ** 2 - jnp.exp(logvar), axis=1))
    return z, kl


if __name__ == "__main__":
    key = jax.random.PRNGKey(0)
    B, INPUT_DIM = 8, 64  # small synthetic shapes; input_dim is the module's ctor arg

    key, kx, keps, kp = jax.random.split(key, 4)
    x = jax.random.uniform(kx, (B, INPUT_DIM), jnp.float32)
    # TODO(synk): torch.distributions.Normal sampling stays outside the kernel;
    # eps ~ N(0,1) is passed in explicitly (could use pltpu.prng_* in-kernel).
    eps = jax.random.normal(keps, (B, 2), jnp.float32)

    params = init_params(kp, INPUT_DIM)
    padded_params = pad_and_cast_params(params, matmul_dtype=jnp.bfloat16)

    z, kl = vae_forward(x, padded_params, eps)
    z = jax.block_until_ready(z)
    kl = jax.block_until_ready(kl)

    z_ref, kl_ref = vae_reference(x, params, eps, matmul_dtype=jnp.bfloat16)
    assert jnp.allclose(z, z_ref, atol=1e-3, rtol=1e-3), "z mismatch vs reference"
    assert jnp.allclose(kl, kl_ref, atol=1e-3, rtol=1e-3), "kl mismatch vs reference"

    print("KERNEL_OK")
</pallas_src>

<mosaic_0001>
module attributes {stable_mosaic.version = 11 : i64} {
  func.func @vae_kernel(%arg0: i32, %arg1: memref<8x64xf32, #tpu.memory_space<vmem>>, %arg2: memref<64x512xbf16, #tpu.memory_space<vmem>>, %arg3: memref<1x512xf32, #tpu.memory_space<vmem>>, %arg4: memref<512x128xbf16, #tpu.memory_space<vmem>>, %arg5: memref<1x128xf32, #tpu.memory_space<vmem>>, %arg6: memref<128x4xbf16, #tpu.memory_space<vmem>>, %arg7: memref<1x4xf32, #tpu.memory_space<vmem>>, %arg8: memref<8x2xf32, #tpu.memory_space<vmem>>, %arg9: memref<8x2xf32, #tpu.memory_space<vmem>>, %arg10: memref<1x1xf32, #tpu.memory_space<smem>>) attributes {dimension_semantics = [#tpu.dimension_semantics<parallel>], iteration_bounds = array<i64: 1>, scalar_prefetch = 0 : i64, scratch_operands = 0 : i64, tpu.core_type = #tpu.core_type<tc>, window_params = [{transform_indices = @transform_0, window_bounds = array<i64: 8, 64>}, {pipeline_mode = #tpu.pipeline_mode<synchronous>, transform_indices = @transform_1, window_bounds = array<i64: 64, 512>}, {pipeline_mode = #tpu.pipeline_mode<synchronous>, transform_indices = @transform_2, window_bounds = array<i64: 1, 512>}, {pipeline_mode = #tpu.pipeline_mode<synchronous>, transform_indices = @transform_3, window_bounds = array<i64: 512, 128>}, {pipeline_mode = #tpu.pipeline_mode<synchronous>, transform_indices = @transform_4, window_bounds = array<i64: 1, 128>}, {pipeline_mode = #tpu.pipeline_mode<synchronous>, transform_indices = @transform_5, window_bounds = array<i64: 128, 4>}, {pipeline_mode = #tpu.pipeline_mode<synchronous>, transform_indices = @transform_6, window_bounds = array<i64: 1, 4>}, {transform_indices = @transform_7, window_bounds = array<i64: 8, 2>}, {transform_indices = @transform_8, window_bounds = array<i64: 8, 2>}, {transform_indices = @transform_9, window_bounds = array<i64: 1, 1>}]} {
    %c0 = arith.constant 0 : index
    %c0_0 = arith.constant 0 : index
    %0 = vector.load %arg1[%c0, %c0_0] : memref<8x64xf32, #tpu.memory_space<vmem>>, vector<8x64xf32>
    %1 = arith.truncf %0 : vector<8x64xf32> to vector<8x64xbf16>
    %c0_1 = arith.constant 0 : index
    %c0_2 = arith.constant 0 : index
    %2 = vector.load %arg2[%c0_1, %c0_2] : memref<64x512xbf16, #tpu.memory_space<vmem>>, vector<64x512xbf16>
    %cst = arith.constant dense<0.000000e+00> : vector<8x512xf32>
    %3 = tpu.matmul %1, %2, %cst {dimension_numbers = #tpu.dot_dimension_numbers<[1], [0], [0], [1], [0, 0, 1, 1], [], []>} : vector<8x64xbf16>, vector<64x512xbf16>, vector<8x512xf32> -> vector<8x512xf32>
    %c0_3 = arith.constant 0 : index
    %c0_4 = arith.constant 0 : index
    %4 = vector.load %arg3[%c0_3, %c0_4] : memref<1x512xf32, #tpu.memory_space<vmem>>, vector<1x512xf32>
    %5 = vector.broadcast %4 : vector<1x512xf32> to vector<8x512xf32>
    %6 = arith.addf %3, %5 : vector<8x512xf32>
    %cst_5 = arith.constant 0.000000e+00 : f32
    %7 = vector.broadcast %cst_5 : f32 to vector<8x512xf32>
    %8 = arith.maximumf %6, %7 : vector<8x512xf32>
    %9 = arith.truncf %8 : vector<8x512xf32> to vector<8x512xbf16>
    %c0_6 = arith.constant 0 : index
    %c0_7 = arith.constant 0 : index
    %10 = vector.load %arg4[%c0_6, %c0_7] : memref<512x128xbf16, #tpu.memory_space<vmem>>, vector<512x128xbf16>
    %cst_8 = arith.constant dense<0.000000e+00> : vector<8x128xf32>
    %11 = tpu.matmul %9, %10, %cst_8 {dimension_numbers = #tpu.dot_dimension_numbers<[1], [0], [0], [1], [0, 0, 1, 1], [], []>} : vector<8x512xbf16>, vector<512x128xbf16>, vector<8x128xf32> -> vector<8x128xf32>
    %c0_9 = arith.constant 0 : index
    %c0_10 = arith.constant 0 : index
    %12 = vector.load %arg5[%c0_9, %c0_10] : memref<1x128xf32, #tpu.memory_space<vmem>>, vector<1x128xf32>
    %13 = vector.broadcast %12 : vector<1x128xf32> to vector<8x128xf32>
    %14 = arith.addf %11, %13 : vector<8x128xf32>
    %cst_11 = arith.constant 0.000000e+00 : f32
    %15 = vector.broadcast %cst_11 : f32 to vector<8x128xf32>
    %16 = arith.maximumf %14, %15 : vector<8x128xf32>
    %17 = arith.truncf %16 : vector<8x128xf32> to vector<8x128xbf16>
    %c0_12 = arith.constant 0 : index
    %c0_13 = arith.constant 0 : index
    %18 = vector.load %arg6[%c0_12, %c0_13] : memref<128x4xbf16, #tpu.memory_space<vmem>>, vector<128x4xbf16>
    %cst_14 = arith.constant dense<0.000000e+00> : vector<8x4xf32>
    %19 = tpu.matmul %17, %18, %cst_14 {dimension_numbers = #tpu.dot_dimension_numbers<[1], [0], [0], [1], [0, 0, 1, 1], [], []>} : vector<8x128xbf16>, vector<128x4xbf16>, vector<8x4xf32> -> vector<8x4xf32>
    %c0_15 = arith.constant 0 : index
    %c0_16 = arith.constant 0 : index
    %20 = vector.load %arg7[%c0_15, %c0_16] : memref<1x4xf32, #tpu.memory_space<vmem>>, vector<1x4xf32>
    %21 = vector.broadcast %20 : vector<1x4xf32> to vector<8x4xf32>
    %22 = arith.addf %19, %21 : vector<8x4xf32>
    %23 = vector.extract_strided_slice %22 {offsets = [0, 0], sizes = [8, 2], strides = [1, 1]} : vector<8x4xf32> to vector<8x2xf32>
    %24 = vector.extract_strided_slice %22 {offsets = [0, 2], sizes = [8, 2], strides = [1, 1]} : vector<8x4xf32> to vector<8x2xf32>
    %cst_17 = arith.constant 5.000000e-01 : f32
    %25 = vector.broadcast %cst_17 : f32 to vector<8x2xf32>
    %26 = arith.mulf %24, %25 : vector<8x2xf32>
    %27 = math.exp %26 : vector<8x2xf32>
    %c0_18 = arith.constant 0 : index
    %c0_19 = arith.constant 0 : index
    %28 = vector.load %arg8[%c0_18, %c0_19] : memref<8x2xf32, #tpu.memory_space<vmem>>, vector<8x2xf32>
    %29 = arith.mulf %27, %28 : vector<8x2xf32>
    %30 = arith.addf %23, %29 : vector<8x2xf32>
    %c0_20 = arith.constant 0 : index
    %c0_21 = arith.constant 0 : index
    %31 = vector.load %arg9[%c0_20, %c0_21] : memref<8x2xf32, #tpu.memory_space<vmem>>, vector<8x2xf32>
    tpu.vector_store %arg9[%c0_20, %c0_21], %30 {strides = array<i32>} : memref<8x2xf32, #tpu.memory_space<vmem>>, vector<8x2xf32>,
    %cst_22 = arith.constant 1.000000e+00 : f32
    %32 = vector.broadcast %cst_22 : f32 to vector<8x2xf32>
    %33 = arith.addf %32, %24 : vector<8x2xf32>
    %34 = arith.mulf %23, %23 : vector<8x2xf32>
    %35 = arith.subf %33, %34 : vector<8x2xf32>
    %36 = arith.mulf %27, %27 : vector<8x2xf32>
    %37 = arith.subf %35, %36 : vector<8x2xf32>
    %38 = vector.shape_cast %37 : vector<8x2xf32> to vector<1x8x2xf32>
    %cst_23 = arith.constant dense<0.000000e+00> : vector<1xf32>
    %39 = vector.multi_reduction <add>, %38, %cst_23 [1, 2] : vector<1x8x2xf32> to vector<1xf32>
    %40 = vector.shape_cast %39 : vector<1xf32> to vector<1x1x1xf32>
    %41 = vector.extract %40[0, 0, 0] : f32 from vector<1x1x1xf32>
    %cst_24 = arith.constant -5.000000e-01 : f32
    %42 = arith.mulf %cst_24, %41 : f32
    %c0_25 = arith.constant 0 : index
    %c0_26 = arith.constant 0 : index
    %43 = memref.load %arg10[%c0_25, %c0_26] : memref<1x1xf32, #tpu.memory_space<smem>>
    memref.store %42, %arg10[%c0_25, %c0_26] : memref<1x1xf32, #tpu.memory_space<smem>>
    return
  }
  func.func @transform_0(%arg0: i32) -> (i32, i32) {
    %c0_i32 = arith.constant 0 : i32
    %c0_i32_0 = arith.constant 0 : i32
    return %arg0, %c0_i32 : i32, i32
  }
  func.func @transform_1(%arg0: i32) -> (i32, i32) {
    %c0_i32 = arith.constant 0 : i32
    %c0_i32_0 = arith.constant 0 : i32
    %c0_i32_1 = arith.constant 0 : i32
    return %c0_i32, %c0_i32_0 : i32, i32
  }
  func.func @transform_2(%arg0: i32) -> (i32, i32) {
    %c0_i32 = arith.constant 0 : i32
    %c0_i32_0 = arith.constant 0 : i32
    %c0_i32_1 = arith.constant 0 : i32
    return %c0_i32, %c0_i32_0 : i32, i32
  }
  func.func @transform_3(%arg0: i32) -> (i32, i32) {
    %c0_i32 = arith.constant 0 : i32
    %c0_i32_0 = arith.constant 0 : i32
    %c0_i32_1 = arith.constant 0 : i32
    return %c0_i32, %c0_i32_0 : i32, i32
  }
  func.func @transform_4(%arg0: i32) -> (i32, i32) {
    %c0_i32 = arith.constant 0 : i32
    %c0_i32_0 = arith.constant 0 : i32
    %c0_i32_1 = arith.constant 0 : i32
    return %c0_i32, %c0_i32_0 : i32, i32
  }
  func.func @transform_5(%arg0: i32) -> (i32, i32) {
    %c0_i32 = arith.constant 0 : i32
    %c0_i32_0 = arith.constant 0 : i32
    %c0_i32_1 = arith.constant 0 : i32
    return %c0_i32, %c0_i32_0 : i32, i32
  }
  func.func @transform_6(%arg0: i32) -> (i32, i32) {
    %c0_i32 = arith.constant 0 : i32
    %c0_i32_0 = arith.constant 0 : i32
    %c0_i32_1 = arith.constant 0 : i32
    return %c0_i32, %c0_i32_0 : i32, i32
  }
  func.func @transform_7(%arg0: i32) -> (i32, i32) {
    %c0_i32 = arith.constant 0 : i32
    %c0_i32_0 = arith.constant 0 : i32
    return %arg0, %c0_i32 : i32, i32
  }
  func.func @transform_8(%arg0: i32) -> (i32, i32) {
    %c0_i32 = arith.constant 0 : i32
    %c0_i32_0 = arith.constant 0 : i32
    return %arg0, %c0_i32 : i32, i32
  }
  func.func @transform_9(%arg0: i32) -> (i32, i32) {
    %c0_i32 = arith.constant 0 : i32
    %c0_i32_0 = arith.constant 0 : i32
    return %arg0, %c0_i32 : i32, i32
  }
}

</mosaic_0001>

<bundles_post_ra>
// kernel: tpu_custom_call.1
= control target key start
LH: loop header
LB: loop body
LE: loop exit
PB: predicated region body
PF: predicated region fallthrough
CT: control target
= control target key end

     0   :  { %15 = vsyncpa [#allocation3], 0  ;;  %s1209_s0 = inlined_call_operand.vmem [shape: f32[8,64], index: 0, kind: input, shape index: {}]   ;;  %s1210_s1 = inlined_call_operand.hbm [shape: bf16[64,512], index: 1, kind: input, shape index: {}]   ;;  %s1211_s2 = inlined_call_operand.vmem [shape: f32[1,512], index: 2, kind: input, shape index: {}]   ;;  %s1212_s3 = inlined_call_operand.hbm [shape: bf16[512,128], index: 3, kind: input, shape index: {}]   ;;  %s1213_s4 = inlined_call_operand.vmem [shape: f32[1,128], index: 4, kind: input, shape index: {}]   ;;  %s1214_s5 = inlined_call_operand.vmem [shape: bf16[128,4], index: 5, kind: input, shape index: {}]   ;;  %s1215_s6 = inlined_call_operand.vmem [shape: f32[1,4], index: 6, kind: input, shape index: {}]   ;;  %s1216_s7 = inlined_call_operand.vmem [shape: f32[8,2], index: 7, kind: input, shape index: {}]   ;;  %s1217_s8 = inlined_call_operand.vmem [shape: f32[8,2], index: 8, kind: output, shape index: {0}]   ;;  %s1218_s9 = inlined_call_operand.hbm [shape: f32[1,1], index: 9, kind: output, shape index: {1}]  }
   0x1   :  { %16 = vsyncpa [#allocation6], 0 }
   0x2   :  { %17 = vsyncpa [#allocation4], 0  ;;  %s1065_s30 = smov [#allocation2]   ;;  %s1005_s13 = scalar_lea.hbm %s1210_s1, 2048 }
   0x3   :  { %s25_s10 = sshll.u32 %s1065_s30, 4  ;;  %p1006_p0 = scmp.ne.s32.totalorder %s1210_s1, %s1005_s13  ;;  %s26_s10 = int_to_ptr.vmem [resolvable:$true] %s25_s10 }
   0x4   :  { %p1009_p1 = scmp.lt.u32.totalorder %s1005_s13, %s1210_s1 }
   0x6   :  { %p1011_p2 = pnand %p1009_p1, %p1006_p0 }
   0x8   :  { %1014 = shalt.err (!%p1011_p2)
}
   0x9   :  { %s1015_s18 = scalar_lea.vmem %s26_s10, 2048  ;;  %p1020_p4 = scmp.lt.s32.totalorder %s26_s10, %s26_s10 }
   0xa   :  { %p1016_p3 = scmp.ne.s32.totalorder %s26_s10, %s1015_s18  ;;  %p1021_p5 = scmp.lt.s32.totalorder %s1015_s18, %s1015_s18 }
   0xc   :  { %p1022_p6 = por %p1021_p5, %p1020_p4 }
   0xe   :  { %p1023_p7 = pnand %p1022_p6, %p1016_p3 }
  0x10   :  { %1026 = shalt.err (!%p1023_p7)
}
  0x11   :  { %s1066_s19 = smov 256   ;;  %s1067_s20 = smov 16  }
  0x12   :  { %31 = dma.hbm_to_vmem [thread:$0]  %s1210_s1, 2048, %s26_s10, [#allocation3], %s1066_s19, %s1066_s19, %s1067_s20  }
  0x13   :  { %s1068_s23 = smov [#allocation5]   ;;  %s1027_s27 = scalar_lea.hbm %s1212_s3, 4096 }
  0x14   :  { %s39_s24 = sshll.u32 %s1068_s23, 4  ;;  %p1028_p8 = scmp.ne.s32.totalorder %s1212_s3, %s1027_s27  ;;  %s40_s24 = int_to_ptr.vmem [resolvable:$true] %s39_s24 }
  0x15   :  { %p1031_p9 = scmp.lt.u32.totalorder %s1027_s27, %s1212_s3 }
  0x17   :  { %p1033_p10 = pnand %p1031_p9, %p1028_p8 }
  0x19   :  { %1036 = shalt.err (!%p1033_p10)
}
  0x1a   :  { %s1037_s12 = scalar_lea.vmem %s40_s24, 4096  ;;  %p1042_p12 = scmp.lt.s32.totalorder %s40_s24, %s40_s24 }
  0x1b   :  { %p1038_p11 = scmp.ne.s32.totalorder %s40_s24, %s1037_s12  ;;  %p1043_p13 = scmp.lt.s32.totalorder %s1037_s12, %s1037_s12 }
  0x1d   :  { %p1044_p0 = por %p1043_p13, %p1042_p12 }
  0x1f   :  { %p1045_p1 = pnand %p1044_p0, %p1038_p11 }
  0x21   :  { %1048 = shalt.err (!%p1045_p1)
}
  0x22   :  { %s1069_s1 = smov 64   ;;  %s1070_s10 = smov 4  }
  0x23   :  { %45 = dma.hbm_to_vmem [thread:$0]  %s1212_s3, 4096, %s40_s24, [#allocation6], %s1069_s1, %s1069_s1, %s1070_s10  }
  0x24   :  { %1059 = dma.done.wait [#allocation3], 2048  }
  0x25   :  { %1060 = vsyncadd [#allocation3], 4294965248 }
  0x26   :  { %1061 = dma.done.wait [#allocation6], 4096  }
  0x27   :  { %1062 = vsyncadd [#allocation6], 4294963200  ;;  %v1071_v0 = vmov 0   ;;  %v939_v1 = vld [vmem:[#allocation2 + $0x4] ss:$16 sps:$4 sm:$0xff]   ;;  %v965_v14 = vld [vmem:[#allocation5 + $0x48] sm:$0xff]   ;;  %v81_v52 = vlaneseq }
  0x28   :  { %217 = vmatprep.mubr.bf16.mxu1 %v1071_v0  ;;  %v941_v2 = vld [vmem:[#allocation2] ss:$16 sps:$4 sm:$0xff]   ;;  %185 = vmatprep.subr.bf16.mxu1 %v939_v1  ;;  %v942_v3 = vld [vmem:[#allocation2 + $0x24] ss:$16 sps:$4 sm:$0xff]   ;;  %v953_v10 = vld [vmem:[#allocation2 + $0xc] ss:$16 sps:$4 sm:$0xff]  }
  0x29   :  { %186 = vmatpush1.bf16.msra.mxu1 %v941_v2  ;;  %v944_v4 = vld [vmem:[#allocation2 + $0x20] ss:$16 sps:$4 sm:$0xff]   ;;  %v945_v5 = vld [vmem:[#allocation2 + $0x44] ss:$16 sps:$4 sm:$0xff]   ;;  %v951_v13 = vld [vmem:[#allocation2 + $0x8] ss:$16 sps:$4 sm:$0xff]  }
  0x2a   :  { %187 = vmatprep.subr.bf16.mxu1 %v942_v3  ;;  %v947_v6 = vld [vmem:[#allocation2 + $0x40] ss:$16 sps:$4 sm:$0xff]   ;;  %v948_v7 = vld [vmem:[#allocation2 + $0x64] ss:$16 sps:$4 sm:$0xff]   ;;  %vm181_vm0 = vcmask 523264   ;;  %v966_v16 = vld [vmem:[#allocation5 + $0x8] sm:$0xff]  }
  0x2b   :  { %v950_v8 = vld [vmem:[#allocation2 + $0x60] ss:$16 sps:$4 sm:$0xff]   ;;  %v956_v17 = vld [vmem:[#allocation2 + $0x2c] ss:$16 sps:$4 sm:$0xff]   ;;  %v954_v19 = vld [vmem:[#allocation2 + $0x28] ss:$16 sps:$4 sm:$0xff]  }
  0x2c   :  { %v61_v9 = vld [vmem:[%s1209_s0] sm:$0xff]  ;;  %v967_v18 = vld [vmem:[#allocation5 + $0x50] sm:$0xff]   ;;  %v969_v21 = vld [vmem:[#allocation5 + $0x58] sm:$0xff]   ;;  %v1072_v51 = vmov 0.0   ;;  %v82_v53 = vshrl.u32 %v81_v52, 7  ;;  %vm1073_vm1 = vmmov 0  }
  0x2d   :  { %188 = vmatpush1.bf16.msra.mxu1 %v944_v4  ;;  %v963_v11 = vld [vmem:[#allocation5 + $0x40] sm:$0xff]   ;;  %v62_v15 = vpack.c.bf16 %v61_v9, %v61_v9  ;;  %v968_v20 = vld [vmem:[#allocation5 + $0x10] sm:$0xff]   ;;  %v959_v22 = vld [vmem:[#allocation2 + $0x4c] ss:$16 sps:$4 sm:$0xff]   ;;  %s1075_s13 = smov 126   ;;  %vm745_vm2 = vcmask 15360  }
  0x2e   :  { %189 = vmatprep.subr.bf16.mxu1 %v945_v5  ;;  %v964_v12 = vld [vmem:[#allocation5] sm:$0xff]   ;;  %852 = vmatprep.subr.bf16.mxu0 %v963_v11  ;;  %v957_v23 = vld [vmem:[#allocation2 + $0x48] ss:$16 sps:$4 sm:$0xff]   ;;  %v962_v26 = vld [vmem:[#allocation2 + $0x6c] ss:$16 sps:$4 sm:$0xff]   ;;  %v83_v54 = vsub.s32 0, %v82_v53 }
  0x2f   :  { %853 = vmatpush3.bf16.msra.mxu0 %v964_v12  ;;  %v970_v24 = vld [vmem:[#allocation5 + $0x18] sm:$0xff]   ;;  %v971_v25 = vld [vmem:[#allocation5 + $0x60] sm:$0xff]   ;;  %v975_v30 = vld [vmem:[#allocation5 + $0x68] sm:$0xff]   ;;  %v87_v56 = vsub.s32 1, %v82_v53  ;;  %s1049_s17 = scalar_lea.hbm %s1218_s9, 16 }
  0x30   :  { %854 = vmatprep.subr.bf16.mxu0 %v965_v14  ;;  %v960_v27 = vld [vmem:[#allocation2 + $0x68] ss:$16 sps:$4 sm:$0xff]   ;;  %v972_v28 = vld [vmem:[#allocation5 + $0xc0] sm:$0xff]   ;;  %v979_v35 = vld [vmem:[#allocation5 + $0x70] sm:$0xff]   ;;  %p1050_p2 = scmp.ne.s32.totalorder %s1218_s9, %s1049_s17  ;;  %p1053_p3 = scmp.lt.u32.totalorder %s1049_s17, %s1218_s9 }
  0x31   :  { %190 = vmatpush1.bf16.msra.mxu1 %v947_v6  ;;  %v973_v29 = vld [vmem:[#allocation5 + $0x20] sm:$0xff]   ;;  %v977_v31 = vld [vmem:[#allocation5 + $0x28] sm:$0xff]   ;;  %v980_v36 = vld [vmem:[#allocation5 + $0xd0] sm:$0xff]   ;;  %v91_v6 = vsub.s32 2, %v82_v53 }
  0x32   :  { %191 = vmatprep.subr.bf16.mxu1 %v948_v7  ;;  %v974_v32 = vld [vmem:[#allocation5 + $0x80] sm:$0xff]   ;;  %v976_v33 = vld [vmem:[#allocation5 + $0xc8] sm:$0xff]   ;;  %v981_v37 = vld [vmem:[#allocation5 + $0x30] sm:$0xff]   ;;  %v95_v7 = vsub.s32 3, %v82_v53  ;;  %p1055_p4 = pnand %p1053_p3, %p1050_p2 }
  0x33   :  { %855 = vmatpush3.bf16.msra.mxu0 %v966_v16  ;;  %v978_v34 = vld [vmem:[#allocation5 + $0x88] sm:$0xff]   ;;  %v982_v38 = vld [vmem:[#allocation5 + $0x90] sm:$0xff]   ;;  %v983_v39 = vld [vmem:[#allocation5 + $0x78] sm:$0xff]  }
  0x34   :  { %856 = vmatprep.subr.bf16.mxu0 %v967_v18  ;;  %v984_v40 = vld [vmem:[#allocation5 + $0xd8] sm:$0xff]   ;;  %v987_v43 = vld [vmem:[#allocation5 + $0xe0] sm:$0xff]   ;;  %v989_v45 = vld [vmem:[#allocation5 + $0xe8] sm:$0xff]  }
  0x35   :  { %192 = vmatpush1.bf16.msra.mxu1 %v950_v8  ;;  %v985_v41 = vld [vmem:[#allocation5 + $0x38] sm:$0xff]   ;;  %v988_v44 = vld [vmem:[#allocation5 + $0xa0] sm:$0xff]   ;;  %v990_v46 = vld [vmem:[#allocation5 + $0xa8] sm:$0xff]  }
  0x36   :  { %226 = vmatprep.subr.bf16.mxu1 %v953_v10  ;;  %v986_v42 = vld [vmem:[#allocation5 + $0x98] sm:$0xff]   ;;  %v991_v47 = vld [vmem:[#allocation5 + $0xf0] sm:$0xff]   ;;  %v79_v55 = vld [vmem:[%s1211_s2] sm:$0xf] }
  0x37   :  { %857 = vmatpush3.bf16.msra.mxu0 %v968_v20  ;;  %v992_v48 = vld [vmem:[#allocation5 + $0xb0] sm:$0xff]   ;;  %v993_v49 = vld [vmem:[#allocation5 + $0xf8] sm:$0xff]   ;;  %v84_v57 = vrot.slane %v79_v55, %v83_v54  ;;  %v88_v58 = vrot.slane %v79_v55, %v87_v56  ;;  %v995_v5 = vld [vmem:[%s1214_s5] sm:$0xff]   ;;  %v92_v9 = vrot.slane %v79_v55, %v91_v6  ;;  %v96_v10 = vrot.slane %v79_v55, %v95_v7 }
  0x38   :  { %808 = vmatmul.mubr.msk.bf16.vlgmr.msra.gmra.mrb[0].mxu1 %vm181_vm0, %v62_v15  ;;  %858 = vmatprep.subr.bf16.mxu0 %v969_v21  ;;  %v994_v50 = vld [vmem:[#allocation5 + $0xb8] sm:$0xff]   ;;  %v996_v8 = vld [vmem:[%s1214_s5 + $0x8] sm:$0xff]   ;;  %v997_v21 = vld [vmem:[%s1214_s5 + $0x10] sm:$0xff]  }
  0x39   :  { %227 = vmatpush1.bf16.msra.mxu1 %v951_v13  ;;  %258 = vmatprep.mubr.bf16.mxu1 %v1071_v0 }
  0x3a   :  { %228 = vmatprep.subr.bf16.mxu1 %v956_v17 }
  0x3b   :  { %859 = vmatpush3.bf16.msra.mxu0 %v970_v24  ;;  %v1000_v24 = vld [vmem:[%s1214_s5 + $0x28] sm:$0xff]  }
  0x3c   :  { %860 = vmatprep.subr.bf16.mxu0 %v971_v25  ;;  %v1001_v25 = vld [vmem:[%s1214_s5 + $0x30] sm:$0xff]  }
  0x3d   :  { %229 = vmatpush1.bf16.msra.mxu1 %v954_v19 }
  0x3e   :  { %230 = vmatprep.subr.bf16.mxu1 %v959_v22  ;;  %v998_v22 = vld [vmem:[%s1214_s5 + $0x18] sm:$0xff]  }
  0x3f   :  { %861 = vmatpush3.bf16.msra.mxu0 %v973_v29 }
  0x40   :  { %862 = vmatprep.subr.bf16.mxu0 %v975_v30 }
  0x41   :  { %231 = vmatpush1.bf16.msra.mxu1 %v957_v23  ;;  %v999_v23 = vld [vmem:[%s1214_s5 + $0x20] sm:$0xff]  }
  0x42   :  { %232 = vmatprep.subr.bf16.mxu1 %v962_v26  ;;  %v1002_v26 = vld [vmem:[%s1214_s5 + $0x38] sm:$0xff]  }
  0x43   :  { %863 = vmatpush3.bf16.msra.mxu0 %v977_v31 }
  0x44   :  { %864 = vmatprep.subr.bf16.mxu0 %v979_v35 }
  0x45   :  { %233 = vmatpush1.bf16.msra.mxu1 %v960_v27 }
  0x46   :  { %874 = vmatprep.subr.bf16.mxu1 %v972_v28 }
  0x47   :  { %865 = vmatpush3.bf16.msra.mxu0 %v981_v37 }
  0x48   :  { %809 = vmatmul.mubr.msk.bf16.vlgmr.msra.gmra.mrb[4].mxu1 %vm181_vm0, %v62_v15  ;;  %866 = vmatprep.subr.bf16.mxu0 %v983_v39 }
  0x49   :  { %875 = vmatpush3.bf16.msra.mxu1 %v974_v32  ;;  %v810_v32 = vld [vmem:[%s1213_s4] ss:$0 sm:$0xff]  ;;  %s1074_s4 = smov 2  }
  0x4a   :  { %876 = vmatprep.subr.bf16.mxu1 %v976_v33 }
  0x4b   :  { %867 = vmatpush3.bf16.msra.mxu0 %v985_v41 }
  0x4c   :  { %905 = vmatprep.subr.bf16.mxu0 %v1072_v51 }
  0x4d   :  { %877 = vmatpush3.bf16.msra.mxu1 %v978_v34 }
  0x4e   :  { %878 = vmatprep.subr.bf16.mxu1 %v980_v36 }
  0x51   :  { %879 = vmatpush3.bf16.msra.mxu1 %v982_v38 }
  0x52   :  { %880 = vmatprep.subr.bf16.mxu1 %v984_v40 }
  0x55   :  { %881 = vmatpush3.bf16.msra.mxu1 %v986_v42  ;;  %v843_v42 = vld [vmem:[%s1215_s6] ss:$0 sm:$0xff] }
  0x56   :  { %882 = vmatprep.subr.bf16.mxu1 %v987_v43 }
  0x59   :  { %883 = vmatpush3.bf16.msra.mxu1 %v988_v44 }
  0x5a   :  { %884 = vmatprep.subr.bf16.mxu1 %v989_v45 }
  0x5d   :  { %885 = vmatpush3.bf16.msra.mxu1 %v990_v46 }
  0x5e   :  { %886 = vmatprep.subr.bf16.mxu1 %v991_v47 }
  0x61   :  { %887 = vmatpush3.bf16.msra.mxu1 %v992_v48 }
  0x62   :  { %888 = vmatprep.subr.bf16.mxu1 %v993_v49 }
  0x65   :  { %889 = vmatpush3.bf16.msra.mxu1 %v994_v50 }
 0x10b   :  { %v219_v59 = vpop.f32.mrb[0].mxu1 }
 0x10c   :  { %v220_v60 = vadd.f32 %v219_v59, %v84_v57  ;;  %v221_v61 = vpop.f32.mrb[1].mxu1  ;;  %v734_v59 = vld [vmem:[%s1216_s7] sm:$0xff] }
 0x10d   :  { %v222_v62 = vadd.f32 %v221_v61, %v88_v58  ;;  %v223_v63 = vpop.f32.mrb[2].mxu1 }
 0x10e   :  { %v267_v0 = vmax.f32 %v220_v60, 0.0  ;;  %v224_v1 = vpop.f32.mrb[3].mxu1 }
 0x10f   :  { %v268_v2 = vmax.f32 %v222_v62, 0.0 }
 0x110   :  { %v271_v3 = vpack.c.bf16 %v267_v0, %v267_v0 }
 0x111   :  { %v272_v4 = vpack.c.bf16 %v268_v2, %v268_v2 }
 0x113   :  { %570 = vmatprep.mubr.bf16.mxu0 %v272_v4 }
 0x114   :  { %571 = vmatmul.mubr.bf16.vlgmr.msra.gmra.mrb[0].mxu0 %v271_v3 }
 0x115   :  { %906 = vmatpush3.bf16.msra.mxu0 %v995_v5  ;;  %921 = vmatprep.mubr.msk.bf16.mxu0 %vm1073_vm1, %v1072_v51 }
 0x116   :  { %907 = vmatprep.subr.bf16.mxu0 %v1072_v51 }
 0x119   :  { %908 = vmatpush3.bf16.msra.mxu0 %v996_v8 }
 0x11a   :  { %909 = vmatprep.subr.bf16.mxu0 %v1072_v51 }
 0x11b   :  { %v260_v11 = vpop.f32.mrb[4].mxu1 }
 0x11c   :  { %v261_v12 = vadd.f32 %v260_v11, %v92_v9  ;;  %v262_v13 = vpop.f32.mrb[5].mxu1 }
 0x11d   :  { %v263_v14 = vadd.f32 %v262_v13, %v96_v10  ;;  %v264_v15 = vpop.f32.mrb[6].mxu1  ;;  %910 = vmatpush3.bf16.msra.mxu0 %v997_v21 }
 0x11e   :  { %v269_v16 = vmax.f32 %v261_v12, 0.0  ;;  %v265_v17 = vpop.f32.mrb[7].mxu1  ;;  %911 = vmatprep.subr.bf16.mxu0 %v1072_v51 }
 0x11f   :  { %v270_v18 = vmax.f32 %v263_v14, 0.0 }
 0x120   :  { %v273_v20 = vpack.c.bf16 %v269_v16, %v269_v16 }
 0x121   :  { %v274_v19 = vpack.c.bf16 %v270_v18, %v270_v18  ;;  %912 = vmatpush3.bf16.msra.mxu0 %v998_v22 }
 0x122   :  { %913 = vmatprep.subr.bf16.mxu0 %v1072_v51 }
 0x123   :  { %610 = vmatprep.mubr.bf16.mxu1 %v274_v19 }
 0x124   :  { %611 = vmatmul.mubr.bf16.vlgmr.msra.gmra.mrb[8].mxu1 %v273_v20 }
 0x125   :  { %914 = vmatpush3.bf16.msra.mxu0 %v999_v23 }
 0x126   :  { %915 = vmatprep.subr.bf16.mxu0 %v1072_v51 }
 0x129   :  { %916 = vmatpush3.bf16.msra.mxu0 %v1000_v24 }
 0x12a   :  { %917 = vmatprep.subr.bf16.mxu0 %v1072_v51 }
 0x12d   :  { %918 = vmatpush3.bf16.msra.mxu0 %v1001_v25 }
 0x12e   :  { %919 = vmatprep.subr.bf16.mxu0 %v1072_v51 }
 0x131   :  { %920 = vmatpush3.bf16.msra.mxu0 %v1002_v26 }
 0x1e7   :  { %v868_v27 = vpop.f32.mrb[0].mxu0 }
 0x1e8   :  { %v869_v28 = vpop.f32.mrb[1].mxu0 }
 0x1e9   :  { %v870_v29 = vadd.f32 %v869_v28, %v868_v27  ;;  %v871_v30 = vpop.f32.mrb[2].mxu0 }
 0x1ea   :  { %v872_v31 = vpop.f32.mrb[3].mxu0 }
 0x1eb   :  { %v573_v35 = vadd.f32 %v870_v29, %v810_v32 }
 0x1f7   :  { %v890_v33 = vpop.f32.mrb[8].mxu1 }
 0x1f8   :  { %v891_v34 = vpop.f32.mrb[9].mxu1 }
 0x1f9   :  { %v892_v36 = vadd.f32 %v891_v34, %v890_v33  ;;  %v893_v37 = vpop.f32.mrb[10].mxu1 }
 0x1fa   :  { %v894_v38 = vpop.f32.mrb[11].mxu1 }
 0x1fb   :  { %v613_v39 = vadd.f32 %v892_v36, %v573_v35 }
 0x1fd   :  { %v618_v40 = vmax.f32 %v613_v39, 0.0 }
 0x1ff   :  { %v619_v41 = vpack.c.bf16 %v618_v40, %v618_v40 }
 0x201   :  { %922 = vmatmul.mubr.bf16.vlgmr.msra.gmra.mrb[4].mxu0 %v619_v41 }
 0x2d4   :  { %v725_v43 = vpop.f32.mrb[4].mxu0 }
 0x2d5   :  { %v726_v44 = vadd.f32 %v843_v42, %v725_v43  ;;  %v923_v45 = vpop.f32.mrb[5].mxu0 }
 0x2d6   :  { %v728_v46 = vpop.f32.mrb[6].mxu0 }
 0x2d7   :  { %v924_v47 = vpop.f32.mrb[7].mxu0  ;;  %v748_v48 = vmul.f32 %v726_v44, %v726_v44  ;;  %v731_v49 = vmul.f32 0.5, %v726_v44  ;;  %v747_v52 = vadd.f32 1.0, %v726_v44 }
 0x2d9   :  { %750 = vrot.lane.b32.xlu0 %v748_v48, %s1074_s4  ;;  %v732_v50 = vmul.f32 1.442695, %v731_v49 }
 0x2db   :  { %1003 = vpow2.f32 %v732_v50 }
 0x2e5   :  { %v1004_v51 = vpop.eup %1003 }
 0x2e6   :  { %v754_v55 = vmul.f32 %v1004_v51, %v1004_v51 }
 0x34b   :  { %v751_v53 = vpop.permute.xlu0 %750 }
 0x34c   :  { %v753_v54 = vsub.f32 %v747_v52, %v751_v53 }
 0x34e   :  { %v755_v56 = vsub.f32 %v753_v54, %v754_v55 }
 0x350   :  { %757 = vrot.lane.b32.xlu0 %v755_v56, %s1075_s13 }
 0x3c2   :  { %v758_v57 = vpop.permute.xlu0 %757 }
 0x3c3   :  { %v760_v58 = vsel %vm745_vm2, %v758_v57, 0.0 }
 0x3c4   :  { %761 = vadd.xlane.f32.xlu1 %v760_v58 }
 0x3d5   :  { %736 = vrot.lane.b32.xlu1 %v734_v59, %s1074_s4 }
 0x451   :  { %v762_v60 = vpop.xlane.xlu1 %761 }
 0x452   :  { %v763_v61 = vrot.slane %v762_v60, 4 }
 0x454   :  { %v764_v62 = vadd.f32 %v763_v61, %v762_v60 }
 0x455   :  { %v737_v63 = vpop.permute.xlu1 %736 }
 0x456   :  { %v765_v0 = vrot.slane %v764_v62, 2  ;;  %v739_v1 = vmul.f32 %v1004_v51, %v737_v63 }
 0x458   :  { %741 = vrot.lane.b32.xlu0 %v739_v1, %s1075_s13  ;;  %v766_v2 = vadd.f32 %v765_v0, %v764_v62 }
 0x45a   :  { %v767_v3 = vrot.slane %v766_v2, 1 }
 0x45c   :  { %v768_v4 = vadd.f32 %v767_v3, %v766_v2 }
 0x45e   :  { %925 = vpush %v768_v4 }
 0x48f   :  { %s926_s3 = spop %925 }
 0x490   :  { %s770_s15 = smul.f32 -0.5, %s926_s3 }
 0x492   :  { %772 = sst [smem:[#allocation7]] %s770_s15 }
 0x493   :  { %1058 = shalt.err (!%p1055_p4)
}
 0x494   :  { %s1076_s20 = smov [#allocation7]  }
 0x495   :  { %782 = dma.smem_to_hbm %s1076_s20, 16, %s1218_s9, [#allocation4]  }
 0x4ca   :  { %v742_v5 = vpop.permute.xlu0 %741 }
 0x4cb   :  { %v744_v6 = vadd.f32 %v742_v5, %v726_v44 }
 0x4cd   :  { %746 = vst.msk [vmem:[%s1217_s8] sm:$0xff] %vm745_vm2, %v744_v6 }
 0x4ce   :  { %1063 = dma.done.wait [#allocation4], 16  }
 0x4cf   :  { %1064 = vsyncadd [#allocation4], 4294967280 }
 0x4d0   :  { %788 = sfence }
 0x4d1   :  { %789 = vsyncpa [#allocation3], 1 }
 0x4d2   :  { %790 = vsyncpa [#allocation6], 1 }
 0x4d3   :  { %791 = vsyncpa [#allocation4], 1 }

</bundles_post_ra>
